<compile_context>
chip_gen: v6e
topology: v6e:2x2x1
jax: 0.10.0
libtpu: 0.0.40
codegen_flags: <defaults>
</compile_context>

<pallas_src>
import jax
import jax.numpy as jnp
from jax.experimental import pallas as pl
from jax.experimental.pallas import tpu as pltpu


_LANES = 128
# ~0.35 us per grid step, expressed in "batch rows worth" of streamed work.
_STEP_OVERHEAD_ROWS = 2048


def _round_up(x, m):
    return ((x + m - 1) // m) * m


def _vmem_physical_bytes():
    try:
        return int(pltpu.get_tpu_info().vmem_capacity_bytes)
    except Exception:
        return 64 << 20  # conservative default (v7x)


def soft_q_kernel(s_ref, a_ref, w1s_ref, w1a_ref, b1_ref, w2_ref, b2_ref,
                  w3_ref, b3_ref, o_ref):
    """One batch tile, batch-major.

    s_ref : (TILE_B, S)    f32   streamed state tile
    a_ref : (TILE_B, A)    f32   streamed action tile
    w1s   : (S, H_pad)     f32   } split first layer (replaces host concat)
    w1a   : (A, H_pad)     f32   }
    w2    : (H_pad, H_pad) bf16
    b1,b2 : (1, H_pad)     f32
    w3    : (1, H_pad)     f32   final layer as a row vector (VPU+XLU, not MXU)
    b3    : (1, 1)         f32
    o_ref : (TILE_B, 1)    f32
    """
    # Layer 1: two small-K contractions instead of a host-side concat.
    h1 = jnp.dot(s_ref[...], w1s_ref[...], preferred_element_type=jnp.float32)
    h1 = h1 + jnp.dot(a_ref[...], w1a_ref[...], preferred_element_type=jnp.float32)
    h1 = jnp.maximum(h1 + b1_ref[...], 0.0)            # f32 (v5e: no bf16 VALU)

    # Layer 2: bf16 operands, f32 accumulate on the MXU.
    h2 = jnp.dot(h1.astype(jnp.bfloat16), w2_ref[...],
                 preferred_element_type=jnp.float32)
    h2 = jnp.maximum(h2 + b2_ref[...], 0.0)

    # Layer 3 (out_features == 1): VPU multiply + lane reduction beats an
    # M=1 MXU matmul; final bias folded in.
    q = jnp.sum(h2 * w3_ref[...], axis=-1, keepdims=True) + b3_ref[...]
    o_ref[...] = q.astype(o_ref.dtype)


def prepare_params(params, state_dim):
    """Split/transpose/pad the weights once, outside the per-step hot path.

    Input params are in natural PyTorch layout: w (out, in), b (out,)."""
    w1, b1 = params["w1"], params["b1"]
    w2, b2 = params["w2"], params["b2"]
    w3, b3 = params["w3"], params["b3"]
    H = w1.shape[0]
    # Hidden width padded to the lane width; 256 when hidden_dim >= 256 so the
    # (H,H) contraction fills the 2x256^2 MXU on v6e/v7x.
    h_mult = 256 if H >= 256 else _LANES
    H_pad = _round_up(H, h_mult)

    w1t = jnp.zeros((w1.shape[1], H_pad), jnp.float32).at[:, :H].set(
        w1.T.astype(jnp.float32))
    w1s = w1t[:state_dim]                 # (S, H_pad) f32
    w1a = w1t[state_dim:]                 # (A, H_pad) f32
    w2t = jnp.zeros((H_pad, H_pad), jnp.bfloat16).at[:H, :H].set(
        w2.T.astype(jnp.bfloat16))
    b1p = jnp.zeros((1, H_pad), jnp.float32).at[0, :H].set(b1.astype(jnp.float32))
    b2p = jnp.zeros((1, H_pad), jnp.float32).at[0, :H].set(b2.astype(jnp.float32))
    w3p = jnp.zeros((1, H_pad), jnp.float32).at[0, :H].set(
        w3.reshape(-1).astype(jnp.float32))
    b3p = b3.reshape(1, 1).astype(jnp.float32)
    return {"w1s": w1s, "w1a": w1a, "b1": b1p, "w2": w2t, "b2": b2p,
            "w3": w3p, "b3": b3p}


def _forward_jnp(state, action, prepared):
    """Pure-XLA path with the same numerics as the kernel (fallback + reference)."""
    p = prepared
    h1 = (jnp.dot(state.astype(jnp.float32), p["w1s"],
                  preferred_element_type=jnp.float32)
          + jnp.dot(action.astype(jnp.float32), p["w1a"],
                    preferred_element_type=jnp.float32))
    h1 = jnp.maximum(h1 + p["b1"], 0.0)
    h2 = jnp.dot(h1.astype(jnp.bfloat16), p["w2"],
                 preferred_element_type=jnp.float32)
    h2 = jnp.maximum(h2 + p["b2"], 0.0)
    return jnp.sum(h2 * p["w3"], axis=-1, keepdims=True) + p["b3"]


def _vmem_bytes_for_tile(tb, s_dim, a_dim, h_pad):
    streamed = 2 * tb * (s_dim + a_dim) * 4          # double-buffered f32 input tiles
    out_buf = 2 * tb * _LANES * 4                    # (tb,1) out block lane-pads to 128
    temps = tb * h_pad * (4 + 4 + 2)                 # h1, h2 (f32) + bf16 copy of h1
    weights = 2 * ((s_dim + a_dim) * h_pad * 4 + h_pad * h_pad * 2
                   + 3 * h_pad * 4 + 8 * _LANES * 4)
    return streamed + out_buf + temps + weights


def _select_tile_b(B, vmem_ok):
    """Batch tile: big enough to amortize per-step overhead, no padding beyond
    the 128-row floor, within VMEM, >=2 grid steps when free (v7x megacore)."""
    b_aligned = _round_up(max(B, 1), _LANES)
    cands = sorted({c for c in (128, 256, 512, 1024, 2048, 4096, 8192)
                    if c <= b_aligned} | {min(b_aligned, 8192)})
    ok = [c for c in cands if vmem_ok(c)] or [128]

    def padded(c):
        return _round_up(B, c)

    def cost(c):
        return (padded(c) // c) * _STEP_OVERHEAD_ROWS + padded(c)

    best = min(ok, key=cost)
    if padded(best) // best < 2:
        alts = [c for c in ok
                if c >= 512 and padded(c) // c >= 2 and padded(c) == padded(best)]
        if alts:
            best = max(alts)
    return best


def soft_q_forward(state, action, prepared, *, tile_b=None, use_pallas=None,
                   min_pallas_batch=256):
    """state: (B, state_dim) f32, action: (B, action_dim) f32 -> (B, 1) f32."""
    B, s_dim = state.shape
    a_dim = action.shape[1]
    h_pad = prepared["w2"].shape[0]

    if use_pallas is None:
        use_pallas = B >= min_pallas_batch
    if not use_pallas:
        # Tiny batches: a plain XLA dot chain beats kernel launch/DMA overhead.
        return _forward_jnp(state, action, prepared)

    state = state.astype(jnp.float32)
    action = action.astype(jnp.float32)

    phys_vmem = _vmem_physical_bytes()
    vmem_ok = lambda c: _vmem_bytes_for_tile(c, s_dim, a_dim, h_pad) <= 0.6 * phys_vmem
    if tile_b is None:
        tile_b = _select_tile_b(B, vmem_ok)
    assert tile_b % 8 == 0, "batch tile must be a sublane multiple"

    B_pad = _round_up(B, tile_b)
    n_tiles = B_pad // tile_b
    if B_pad != B:
        # Only pads when B doesn't divide the tile; tile selection never pads
        # beyond the 128-row floor, so this copy stays small.
        state = jnp.pad(state, ((0, B_pad - B), (0, 0)))
        action = jnp.pad(action, ((0, B_pad - B), (0, 0)))

    need = _vmem_bytes_for_tile(tile_b, s_dim, a_dim, h_pad)
    vmem_limit = int(max(32 << 20, min(2 * need + (8 << 20), int(0.75 * phys_vmem))))

    flops = 2 * B_pad * h_pad * (s_dim + a_dim + h_pad + 1)
    bytes_accessed = (B_pad * (s_dim + a_dim) * 4 + B_pad * 4
                      + (s_dim + a_dim) * h_pad * 4 + h_pad * h_pad * 2
                      + 3 * h_pad * 4 + 4)

    def resident(arr):
        # Full-array block, constant index_map -> fetched once, VMEM resident.
        # TODO(synk): at production hidden sizes pass pipeline_mode=pl.Buffered(1)
        # here to drop the default double-buffering of these weights (v7x VMEM).
        return pl.BlockSpec(arr.shape, lambda i: (0,) * arr.ndim)

    p = prepared
    out = pl.pallas_call(
        soft_q_kernel,
        out_shape=jax.ShapeDtypeStruct((B_pad, 1), jnp.float32),
        grid=(n_tiles,),
        in_specs=[
            pl.BlockSpec((tile_b, s_dim), lambda i: (i, 0)),   # streamed state
            pl.BlockSpec((tile_b, a_dim), lambda i: (i, 0)),   # streamed action
            resident(p["w1s"]), resident(p["w1a"]), resident(p["b1"]),
            resident(p["w2"]), resident(p["b2"]),
            resident(p["w3"]), resident(p["b3"]),
        ],
        out_specs=pl.BlockSpec((tile_b, 1), lambda i: (i, 0)),
        compiler_params=pltpu.CompilerParams(
            dimension_semantics=("parallel",),
            vmem_limit_bytes=vmem_limit),
        cost_estimate=pl.CostEstimate(flops=int(flops), transcendentals=0,
                                      bytes_accessed=int(bytes_accessed)),
    )(state, action, p["w1s"], p["w1a"], p["b1"], p["w2"], p["b2"],
      p["w3"], p["b3"])

    return out[:B]


def init_params(key, state_dim, action_dim, hidden_dim, init_w=0.003):
    """Mirror the PyTorch module's init; weights in natural (out, in) form."""
    d_in = state_dim + action_dim
    k1, k2, k3, k4, k5, k6 = jax.random.split(key, 6)

    def torch_linear(kw, kb, fan_in, fan_out):
        bound = 1.0 / float(jnp.sqrt(jnp.float32(fan_in)))
        w = jax.random.uniform(kw, (fan_out, fan_in), jnp.float32, -bound, bound)
        b = jax.random.uniform(kb, (fan_out,), jnp.float32, -bound, bound)
        return w, b

    w1, b1 = torch_linear(k1, k2, d_in, hidden_dim)
    w2, b2 = torch_linear(k3, k4, hidden_dim, hidden_dim)
    w3 = jax.random.uniform(k5, (1, hidden_dim), jnp.float32, -init_w, init_w)
    b3 = jax.random.uniform(k6, (1,), jnp.float32, -init_w, init_w)
    return {"w1": w1, "b1": b1, "w2": w2, "b2": b2, "w3": w3, "b3": b3}


def reference_forward_f32(state, action, params):
    """True f32 PyTorch-semantics reference."""
    x = jnp.concatenate([state, action], axis=-1)
    h1 = jnp.maximum(x @ params["w1"].T + params["b1"][None, :], 0.0)
    h2 = jnp.maximum(h1 @ params["w2"].T + params["b2"][None, :], 0.0)
    return h2 @ params["w3"].T + params["b3"][None, :]


if __name__ == "__main__":
    key = jax.random.PRNGKey(0)
    kp, k1, k2, k3, k4 = jax.random.split(key, 5)

    state_dim, action_dim, hidden_dim = 16, 8, 32
    params = init_params(kp, state_dim, action_dim, hidden_dim)
    prepared = prepare_params(params, state_dim)

    # 1) Tiny batch -> plain jnp fallback (kernel launch not worth it there).
    s8 = jax.random.normal(k1, (8, state_dim), jnp.float32)
    a8 = jax.random.normal(k2, (8, action_dim), jnp.float32)
    out8 = jax.block_until_ready(soft_q_forward(s8, a8, prepared))
    assert out8.shape == (8, 1), out8.shape
    assert jnp.allclose(out8, reference_forward_f32(s8, a8, params),
                        atol=1e-2, rtol=0.0)

    # 2) Pallas path, non-tile-aligned batch (exercises padding + 2-step grid).
    B = 200
    s = jax.random.normal(k3, (B, state_dim), jnp.float32)
    a = jax.random.normal(k4, (B, action_dim), jnp.float32)
    out = jax.block_until_ready(
        soft_q_forward(s, a, prepared, use_pallas=True, tile_b=128))
    ref_bits = _forward_jnp(s, a, prepared)          # same numerics as the kernel
    ref_f32 = reference_forward_f32(s, a, params)    # f32 PyTorch semantics
    assert out.shape == (B, 1), out.shape
    assert jnp.allclose(out, ref_bits, atol=1e-3, rtol=1e-3), \
        float(jnp.max(jnp.abs(out - ref_bits)))
    assert jnp.allclose(out, ref_f32, atol=1e-2, rtol=0.0), \
        float(jnp.max(jnp.abs(out - ref_f32)))

    # 3) Pallas path with automatic tile selection.
    B2 = 512
    s2 = jax.random.normal(k1, (B2, state_dim), jnp.float32)
    a2 = jax.random.normal(k2, (B2, action_dim), jnp.float32)
    out2 = jax.block_until_ready(soft_q_forward(s2, a2, prepared, use_pallas=True))
    assert out2.shape == (B2, 1), out2.shape
    assert jnp.allclose(out2, _forward_jnp(s2, a2, prepared), atol=1e-3, rtol=1e-3)

    print("KERNEL_OK")
</pallas_src>

<mosaic_0001>
module attributes {stable_mosaic.version = 11 : i64} {
  func.func @soft_q_kernel(%arg0: i32, %arg1: memref<128x16xf32, #tpu.memory_space<vmem>>, %arg2: memref<128x8xf32, #tpu.memory_space<vmem>>, %arg3: memref<16x128xf32, #tpu.memory_space<vmem>>, %arg4: memref<8x128xf32, #tpu.memory_space<vmem>>, %arg5: memref<1x128xf32, #tpu.memory_space<vmem>>, %arg6: memref<128x128xbf16, #tpu.memory_space<vmem>>, %arg7: memref<1x128xf32, #tpu.memory_space<vmem>>, %arg8: memref<1x128xf32, #tpu.memory_space<vmem>>, %arg9: memref<1x1xf32, #tpu.memory_space<vmem>>, %arg10: memref<128x1xf32, #tpu.memory_space<vmem>>) attributes {dimension_semantics = [#tpu.dimension_semantics<parallel>], iteration_bounds = array<i64: 2>, scalar_prefetch = 0 : i64, scratch_operands = 0 : i64, tpu.core_type = #tpu.core_type<tc>, window_params = [{transform_indices = @transform_0, window_bounds = array<i64: 128, 16>}, {transform_indices = @transform_1, window_bounds = array<i64: 128, 8>}, {pipeline_mode = #tpu.pipeline_mode<synchronous>, transform_indices = @transform_2, window_bounds = array<i64: 16, 128>}, {pipeline_mode = #tpu.pipeline_mode<synchronous>, transform_indices = @transform_3, window_bounds = array<i64: 8, 128>}, {pipeline_mode = #tpu.pipeline_mode<synchronous>, transform_indices = @transform_4, window_bounds = array<i64: 1, 128>}, {pipeline_mode = #tpu.pipeline_mode<synchronous>, transform_indices = @transform_5, window_bounds = array<i64: 128, 128>}, {pipeline_mode = #tpu.pipeline_mode<synchronous>, transform_indices = @transform_6, window_bounds = array<i64: 1, 128>}, {pipeline_mode = #tpu.pipeline_mode<synchronous>, transform_indices = @transform_7, window_bounds = array<i64: 1, 128>}, {pipeline_mode = #tpu.pipeline_mode<synchronous>, transform_indices = @transform_8, window_bounds = array<i64: 1, 1>}, {transform_indices = @transform_9, window_bounds = array<i64: 128, 1>}]} {
    %c0 = arith.constant 0 : index
    %c0_0 = arith.constant 0 : index
    %0 = vector.load %arg1[%c0, %c0_0] : memref<128x16xf32, #tpu.memory_space<vmem>>, vector<128x16xf32>
    %c0_1 = arith.constant 0 : index
    %c0_2 = arith.constant 0 : index
    %1 = vector.load %arg3[%c0_1, %c0_2] : memref<16x128xf32, #tpu.memory_space<vmem>>, vector<16x128xf32>
    %cst = arith.constant dense<0.000000e+00> : vector<128x128xf32>
    %2 = tpu.matmul %0, %1, %cst {dimension_numbers = #tpu.dot_dimension_numbers<[1], [0], [0], [1], [0, 0, 1, 1], [], []>} : vector<128x16xf32>, vector<16x128xf32>, vector<128x128xf32> -> vector<128x128xf32>
    %c0_3 = arith.constant 0 : index
    %c0_4 = arith.constant 0 : index
    %3 = vector.load %arg2[%c0_3, %c0_4] : memref<128x8xf32, #tpu.memory_space<vmem>>, vector<128x8xf32>
    %c0_5 = arith.constant 0 : index
    %c0_6 = arith.constant 0 : index
    %4 = vector.load %arg4[%c0_5, %c0_6] : memref<8x128xf32, #tpu.memory_space<vmem>>, vector<8x128xf32>
    %cst_7 = arith.constant dense<0.000000e+00> : vector<128x128xf32>
    %5 = tpu.matmul %3, %4, %cst_7 {dimension_numbers = #tpu.dot_dimension_numbers<[1], [0], [0], [1], [0, 0, 1, 1], [], []>} : vector<128x8xf32>, vector<8x128xf32>, vector<128x128xf32> -> vector<128x128xf32>
    %6 = arith.addf %2, %5 : vector<128x128xf32>
    %c0_8 = arith.constant 0 : index
    %c0_9 = arith.constant 0 : index
    %7 = vector.load %arg5[%c0_8, %c0_9] : memref<1x128xf32, #tpu.memory_space<vmem>>, vector<1x128xf32>
    %8 = vector.broadcast %7 : vector<1x128xf32> to vector<128x128xf32>
    %9 = arith.addf %6, %8 : vector<128x128xf32>
    %cst_10 = arith.constant 0.000000e+00 : f32
    %10 = vector.broadcast %cst_10 : f32 to vector<128x128xf32>
    %11 = arith.maximumf %9, %10 : vector<128x128xf32>
    %12 = arith.truncf %11 : vector<128x128xf32> to vector<128x128xbf16>
    %c0_11 = arith.constant 0 : index
    %c0_12 = arith.constant 0 : index
    %13 = vector.load %arg6[%c0_11, %c0_12] : memref<128x128xbf16, #tpu.memory_space<vmem>>, vector<128x128xbf16>
    %cst_13 = arith.constant dense<0.000000e+00> : vector<128x128xf32>
    %14 = tpu.matmul %12, %13, %cst_13 {dimension_numbers = #tpu.dot_dimension_numbers<[1], [0], [0], [1], [0, 0, 1, 1], [], []>} : vector<128x128xbf16>, vector<128x128xbf16>, vector<128x128xf32> -> vector<128x128xf32>
    %c0_14 = arith.constant 0 : index
    %c0_15 = arith.constant 0 : index
    %15 = vector.load %arg7[%c0_14, %c0_15] : memref<1x128xf32, #tpu.memory_space<vmem>>, vector<1x128xf32>
    %16 = vector.broadcast %15 : vector<1x128xf32> to vector<128x128xf32>
    %17 = arith.addf %14, %16 : vector<128x128xf32>
    %cst_16 = arith.constant 0.000000e+00 : f32
    %18 = vector.broadcast %cst_16 : f32 to vector<128x128xf32>
    %19 = arith.maximumf %17, %18 : vector<128x128xf32>
    %c0_17 = arith.constant 0 : index
    %c0_18 = arith.constant 0 : index
    %20 = vector.load %arg8[%c0_17, %c0_18] : memref<1x128xf32, #tpu.memory_space<vmem>>, vector<1x128xf32>
    %21 = vector.broadcast %20 : vector<1x128xf32> to vector<128x128xf32>
    %22 = arith.mulf %19, %21 : vector<128x128xf32>
    %cst_19 = arith.constant dense<0.000000e+00> : vector<128xf32>
    %23 = vector.multi_reduction <add>, %22, %cst_19 [1] : vector<128x128xf32> to vector<128xf32>
    %24 = vector.shape_cast %23 : vector<128xf32> to vector<128x1xf32>
    %c0_20 = arith.constant 0 : index
    %c0_21 = arith.constant 0 : index
    %25 = vector.load %arg9[%c0_20, %c0_21] : memref<1x1xf32, #tpu.memory_space<vmem>>, vector<1x1xf32>
    %26 = vector.broadcast %25 : vector<1x1xf32> to vector<128x1xf32>
    %27 = arith.addf %24, %26 : vector<128x1xf32>
    %c0_22 = arith.constant 0 : index
    %c0_23 = arith.constant 0 : index
    %28 = vector.load %arg10[%c0_22, %c0_23] : memref<128x1xf32, #tpu.memory_space<vmem>>, vector<128x1xf32>
    tpu.vector_store %arg10[%c0_22, %c0_23], %27 {strides = array<i32>} : memref<128x1xf32, #tpu.memory_space<vmem>>, vector<128x1xf32>,
    return
  }
  func.func @transform_0(%arg0: i32) -> (i32, i32) {
    %c0_i32 = arith.constant 0 : i32
    %c0_i32_0 = arith.constant 0 : i32
    return %arg0, %c0_i32 : i32, i32
  }
  func.func @transform_1(%arg0: i32) -> (i32, i32) {
    %c0_i32 = arith.constant 0 : i32
    %c0_i32_0 = arith.constant 0 : i32
    return %arg0, %c0_i32 : i32, i32
  }
  func.func @transform_2(%arg0: i32) -> (i32, i32) {
    %c0_i32 = arith.constant 0 : i32
    %c0_i32_0 = arith.constant 0 : i32
    %c0_i32_1 = arith.constant 0 : i32
    return %c0_i32, %c0_i32_0 : i32, i32
  }
  func.func @transform_3(%arg0: i32) -> (i32, i32) {
    %c0_i32 = arith.constant 0 : i32
    %c0_i32_0 = arith.constant 0 : i32
    %c0_i32_1 = arith.constant 0 : i32
    return %c0_i32, %c0_i32_0 : i32, i32
  }
  func.func @transform_4(%arg0: i32) -> (i32, i32) {
    %c0_i32 = arith.constant 0 : i32
    %c0_i32_0 = arith.constant 0 : i32
    %c0_i32_1 = arith.constant 0 : i32
    return %c0_i32, %c0_i32_0 : i32, i32
  }
  func.func @transform_5(%arg0: i32) -> (i32, i32) {
    %c0_i32 = arith.constant 0 : i32
    %c0_i32_0 = arith.constant 0 : i32
    %c0_i32_1 = arith.constant 0 : i32
    return %c0_i32, %c0_i32_0 : i32, i32
  }
  func.func @transform_6(%arg0: i32) -> (i32, i32) {
    %c0_i32 = arith.constant 0 : i32
    %c0_i32_0 = arith.constant 0 : i32
    %c0_i32_1 = arith.constant 0 : i32
    return %c0_i32, %c0_i32_0 : i32, i32
  }
  func.func @transform_7(%arg0: i32) -> (i32, i32) {
    %c0_i32 = arith.constant 0 : i32
    %c0_i32_0 = arith.constant 0 : i32
    %c0_i32_1 = arith.constant 0 : i32
    return %c0_i32, %c0_i32_0 : i32, i32
  }
  func.func @transform_8(%arg0: i32) -> (i32, i32) {
    %c0_i32 = arith.constant 0 : i32
    %c0_i32_0 = arith.constant 0 : i32
    %c0_i32_1 = arith.constant 0 : i32
    return %c0_i32, %c0_i32_0 : i32, i32
  }
  func.func @transform_9(%arg0: i32) -> (i32, i32) {
    %c0_i32 = arith.constant 0 : i32
    %c0_i32_0 = arith.constant 0 : i32
    return %arg0, %c0_i32 : i32, i32
  }
}

</mosaic_0001>

<bundles_post_ra>
// kernel: tpu_custom_call.1
= control target key start
LH: loop header
LB: loop body
LE: loop exit
PB: predicated region body
PF: predicated region fallthrough
CT: control target
= control target key end

     0   :  { %s1465_s11 = smov 0   ;;  %s1688_s0 = inlined_call_operand.vmem [shape: f32[256,16], index: 0, kind: input, shape index: {}]   ;;  %s1689_s1 = inlined_call_operand.vmem [shape: f32[256,8], index: 1, kind: input, shape index: {}]   ;;  %s1690_s2 = inlined_call_operand.vmem [shape: f32[16,128], index: 2, kind: input, shape index: {}]   ;;  %s1691_s3 = inlined_call_operand.vmem [shape: f32[8,128], index: 3, kind: input, shape index: {}]   ;;  %s1692_s4 = inlined_call_operand.vmem [shape: f32[1,128], index: 4, kind: input, shape index: {}]   ;;  %s1693_s5 = inlined_call_operand.vmem [shape: bf16[128,128], index: 5, kind: input, shape index: {}]   ;;  %s1694_s6 = inlined_call_operand.vmem [shape: f32[1,128], index: 6, kind: input, shape index: {}]   ;;  %s1695_s7 = inlined_call_operand.vmem [shape: f32[1,128], index: 7, kind: input, shape index: {}]   ;;  %s1696_s8 = inlined_call_operand.<no memory space> [shape: f32[1,1], index: 8, kind: input, shape index: {}]   ;;  %s1697_s9 = inlined_call_operand.vmem [shape: f32[256,1], index: 9, kind: output, shape index: {}]  }
   0x1   :  { %v14_v0 = vstv %s1696_s8 }
   0x2   :  { %15 = vst [vmem:[#allocation2] sm:$0x1] %v14_v0 }
   0x3 LB: > { %s1178_s12 = sadd.s32 4294967295, %s1410_s11   ;;  %p1182_p0 = scmp.ge.s32.totalorder %s1410_s11, 1  ;;  %s1410_s11 = sphi %s1465_s11, %s21_s11  }
   0x4   : > { %p301_p1 = scmp.lt.s32.totalorder %s1410_s11, 3 }
   0x6   : > { %p302_p2 = pnand %p1182_p0, %p301_p1 }
   0x7   : > { %s1183_s18 = sshll.u32 (!%p302_p2), %s1178_s12, 4 }
   0x8   : > { %305 = sbr.rel (%p302_p2) target bundleno = 600 (0x258), region = 56  ;;  %p343_p3 = scmp.lt.s32.totalorder (!%p302_p2), %s1183_s18, 31 }
   0xd   : > { %v378_v1 = vld [vmem:[%s1690_s2 + $0x8] sm:$0xff]  ;;  %v395_v2 = vld [vmem:[%s1691_s3] sm:$0xff]  ;;  %v1396_v4 = vld [vmem:[%s1693_s5 + $0x38] sm:$0xff]   ;;  %s1699_s18 = smov (!%p343_p3, %s1183_s18), 31  ;;  %vm396_vm0 = vcmask 64512   ;;  %vm590_vm1 = vcmask 130048  }
   0xe   : > { %v377_v3 = vld [vmem:[%s1690_s2] sm:$0xff]  ;;  %1312 = vmatprep.subr.mxu1 %v378_v1  ;;  %1286 = vmatprep.subr.mxu0 %v395_v2  ;;  %s1485_s21 = sshll.u32 %s1699_s18, 3  ;;  %v1397_v5 = vld [vmem:[%s1693_s5 + $0x30] sm:$0xff]   ;;  %v1398_v16 = vld [vmem:[%s1693_s5 + $0x28] sm:$0xff]   ;;  %vm1093_vm2 = vcmask 7168  }
   0xf   : > { %1313 = vmatpush3.msra.mxu1 %v378_v1  ;;  %1287 = vmatpush3.msra.mxu0 %v395_v2  ;;  %s1491_s24 = scalar_lea.vmem %s1689_s1, %s1485_s21  ;;  %s1497_s27 = scalar_lea.vmem %s1688_s0, %s1485_s21  ;;  %v1399_v21 = vld [vmem:[%s1693_s5 + $0x20] sm:$0xff]   ;;  %v1400_v26 = vld [vmem:[%s1693_s5 + $0x18] sm:$0xff]   ;;  %v1401_v41 = vld [vmem:[%s1693_s5 + $0x10] sm:$0xff]  }
  0x10   : > { %1314 = vmatprep.subr.mxu1 %v377_v3  ;;  %1340 = vmatprep.subr.bf16.mxu0 %v1396_v4  ;;  %v379_v6 = vld [vmem:[%s1491_s24] sm:$0xff]  ;;  %v380_v8 = vld [vmem:[%s1491_s24 + $0x8] sm:$0xff]  ;;  %v381_v10 = vld [vmem:[%s1491_s24 + $0x10] sm:$0xff]  ;;  %s1651_s30 = scalar_lea.vmem %s1697_s9, %s1485_s21 }
  0x11   : > { %1315 = vmatpush3.msra.mxu1 %v377_v3  ;;  %v361_v7 = vld [vmem:[%s1497_s27] sm:$0xff]  ;;  %1288 = vmatprep.mubr.msk.f32.mxu0 %vm396_vm0, %v379_v6  ;;  %v362_v9 = vld [vmem:[%s1497_s27 + $0x8] sm:$0xff]  ;;  %v363_v11 = vld [vmem:[%s1497_s27 + $0x10] sm:$0xff] }
  0x12   : > { %1372 = vmatprep.subr.bf16.mxu1 %v1396_v4  ;;  %1316 = vmatprep.mubr.msk.f32.mxu1 %vm590_vm1, %v361_v7  ;;  %v382_v12 = vld [vmem:[%s1491_s24 + $0x18] sm:$0xff]  ;;  %v383_v14 = vld [vmem:[%s1491_s24 + $0x20] sm:$0xff]  ;;  %v384_v17 = vld [vmem:[%s1491_s24 + $0x28] sm:$0xff] }
  0x13   : > { %1289 = vmatmul.mubr.msk.f32.vlgmr.msra.gmra.mxu0 %vm396_vm0, %v380_v8  ;;  %1317 = vmatmul.mubr.msk.f32.vlgmr.msra.gmra.mxu1 %vm590_vm1, %v362_v9  ;;  %v364_v13 = vld [vmem:[%s1497_s27 + $0x18] sm:$0xff]  ;;  %v365_v15 = vld [vmem:[%s1497_s27 + $0x20] sm:$0xff]  ;;  %v366_v18 = vld [vmem:[%s1497_s27 + $0x28] sm:$0xff] }
  0x14   : > { %1291 = vmatprep.mubr.msk.f32.mxu0 %vm396_vm0, %v381_v10  ;;  %1319 = vmatprep.mubr.msk.f32.mxu1 %vm590_vm1, %v363_v11  ;;  %v385_v19 = vld [vmem:[%s1491_s24 + $0x30] sm:$0xff]  ;;  %v386_v22 = vld [vmem:[%s1491_s24 + $0x38] sm:$0xff]  ;;  %v387_v24 = vld [vmem:[%s1491_s24 + $0x40] sm:$0xff] }
  0x15   : > { %1341 = vmatpush3.bf16.msra.mxu0 %v1396_v4  ;;  %1380 = vmatpush3.bf16.msra.mxu1 %v1396_v4  ;;  %v367_v20 = vld [vmem:[%s1497_s27 + $0x30] sm:$0xff]  ;;  %v368_v23 = vld [vmem:[%s1497_s27 + $0x38] sm:$0xff]  ;;  %v369_v25 = vld [vmem:[%s1497_s27 + $0x40] sm:$0xff] }
  0x16   : > { %1342 = vmatprep.subr.bf16.mxu0 %v1397_v5  ;;  %1373 = vmatprep.subr.bf16.mxu1 %v1397_v5  ;;  %v388_v27 = vld [vmem:[%s1491_s24 + $0x48] sm:$0xff]  ;;  %v389_v29 = vld [vmem:[%s1491_s24 + $0x50] sm:$0xff]  ;;  %v390_v31 = vld [vmem:[%s1491_s24 + $0x58] sm:$0xff] }
  0x17   : > { %1292 = vmatmul.mubr.msk.f32.gmra.mxu0 %vm396_vm0, %v382_v12  ;;  %1320 = vmatmul.mubr.msk.f32.gmra.mxu1 %vm590_vm1, %v364_v13  ;;  %v370_v28 = vld [vmem:[%s1497_s27 + $0x48] sm:$0xff]  ;;  %v371_v30 = vld [vmem:[%s1497_s27 + $0x50] sm:$0xff]  ;;  %v372_v32 = vld [vmem:[%s1497_s27 + $0x58] sm:$0xff] }
  0x18   : > { %1294 = vmatprep.mubr.msk.f32.mxu0 %vm396_vm0, %v383_v14  ;;  %1322 = vmatprep.mubr.msk.f32.mxu1 %vm590_vm1, %v365_v15  ;;  %v391_v33 = vld [vmem:[%s1491_s24 + $0x60] sm:$0xff]  ;;  %v392_v35 = vld [vmem:[%s1491_s24 + $0x68] sm:$0xff]  ;;  %v393_v37 = vld [vmem:[%s1491_s24 + $0x70] sm:$0xff] }
  0x19   : > { %1343 = vmatpush3.bf16.msra.mxu0 %v1397_v5  ;;  %1381 = vmatpush3.bf16.msra.mxu1 %v1397_v5  ;;  %v373_v34 = vld [vmem:[%s1497_s27 + $0x60] sm:$0xff]  ;;  %v374_v36 = vld [vmem:[%s1497_s27 + $0x68] sm:$0xff]  ;;  %v375_v38 = vld [vmem:[%s1497_s27 + $0x70] sm:$0xff] }
  0x1a   : > { %1344 = vmatprep.subr.bf16.mxu0 %v1398_v16  ;;  %1374 = vmatprep.subr.bf16.mxu1 %v1398_v16  ;;  %v394_v39 = vld [vmem:[%s1491_s24 + $0x78] sm:$0xff]  ;;  %v1402_v42 = vld [vmem:[%s1693_s5 + $0x8] sm:$0xff]   ;;  %v1403_v43 = vld [vmem:[%s1693_s5] sm:$0xff]  }
  0x1b   : > { %1295 = vmatmul.mubr.msk.f32.gmra.mxu0 %vm396_vm0, %v384_v17  ;;  %1323 = vmatmul.mubr.msk.f32.gmra.mxu1 %vm590_vm1, %v366_v18  ;;  %v376_v40 = vld [vmem:[%s1497_s27 + $0x78] sm:$0xff]  ;;  %v1587_v46 = vld [vmem:[%s1692_s4] ss:$0 sm:$0xff] }
  0x1c   : > { %1297 = vmatprep.mubr.msk.f32.mxu0 %vm396_vm0, %v385_v19  ;;  %1325 = vmatprep.mubr.msk.f32.mxu1 %vm590_vm1, %v367_v20 }
  0x1d   : > { %1345 = vmatpush3.bf16.msra.mxu0 %v1398_v16  ;;  %1382 = vmatpush3.bf16.msra.mxu1 %v1398_v16 }
  0x1e   : > { %1346 = vmatprep.subr.bf16.mxu0 %v1399_v21  ;;  %1375 = vmatprep.subr.bf16.mxu1 %v1399_v21 }
  0x1f   : > { %1298 = vmatmul.mubr.msk.f32.gmra.mxu0 %vm396_vm0, %v386_v22  ;;  %1326 = vmatmul.mubr.msk.f32.gmra.mxu1 %vm590_vm1, %v368_v23 }
  0x20   : > { %1300 = vmatprep.mubr.msk.f32.mxu0 %vm396_vm0, %v387_v24  ;;  %1328 = vmatprep.mubr.msk.f32.mxu1 %vm590_vm1, %v369_v25 }
  0x21   : > { %1347 = vmatpush3.bf16.msra.mxu0 %v1399_v21  ;;  %1383 = vmatpush3.bf16.msra.mxu1 %v1399_v21 }
  0x22   : > { %1348 = vmatprep.subr.bf16.mxu0 %v1400_v26  ;;  %1376 = vmatprep.subr.bf16.mxu1 %v1400_v26 }
  0x23   : > { %1301 = vmatmul.mubr.msk.f32.gmra.mxu0 %vm396_vm0, %v388_v27  ;;  %1329 = vmatmul.mubr.msk.f32.gmra.mxu1 %vm590_vm1, %v370_v28 }
  0x24   : > { %1303 = vmatprep.mubr.msk.f32.mxu0 %vm396_vm0, %v389_v29  ;;  %1331 = vmatprep.mubr.msk.f32.mxu1 %vm590_vm1, %v371_v30 }
  0x25   : > { %1349 = vmatpush3.bf16.msra.mxu0 %v1400_v26  ;;  %1384 = vmatpush3.bf16.msra.mxu1 %v1400_v26 }
  0x26   : > { %1350 = vmatprep.subr.bf16.mxu0 %v1401_v41  ;;  %1377 = vmatprep.subr.bf16.mxu1 %v1401_v41 }
  0x27   : > { %1304 = vmatmul.mubr.msk.f32.gmra.mxu0 %vm396_vm0, %v390_v31  ;;  %1332 = vmatmul.mubr.msk.f32.gmra.mxu1 %vm590_vm1, %v372_v32 }
  0x28   : > { %1306 = vmatprep.mubr.msk.f32.mxu0 %vm396_vm0, %v391_v33  ;;  %1334 = vmatprep.mubr.msk.f32.mxu1 %vm590_vm1, %v373_v34 }
  0x29   : > { %1351 = vmatpush3.bf16.msra.mxu0 %v1401_v41  ;;  %1385 = vmatpush3.bf16.msra.mxu1 %v1401_v41 }
  0x2a   : > { %1352 = vmatprep.subr.bf16.mxu0 %v1402_v42  ;;  %1378 = vmatprep.subr.bf16.mxu1 %v1402_v42 }
  0x2b   : > { %1307 = vmatmul.mubr.msk.f32.gmra.mxu0 %vm396_vm0, %v392_v35  ;;  %1335 = vmatmul.mubr.msk.f32.gmra.mxu1 %vm590_vm1, %v374_v36 }
  0x2c   : > { %1309 = vmatprep.mubr.msk.f32.mxu0 %vm396_vm0, %v393_v37  ;;  %1337 = vmatprep.mubr.msk.f32.mxu1 %vm590_vm1, %v375_v38 }
  0x2d   : > { %1353 = vmatpush3.bf16.msra.mxu0 %v1402_v42  ;;  %1386 = vmatpush3.bf16.msra.mxu1 %v1402_v42 }
  0x2e   : > { %1354 = vmatprep.subr.bf16.mxu0 %v1403_v43  ;;  %1379 = vmatprep.subr.bf16.mxu1 %v1403_v43 }
  0x2f   : > { %1310 = vmatmul.mubr.msk.f32.gmra.mxu0 %vm396_vm0, %v394_v39  ;;  %1338 = vmatmul.mubr.msk.f32.gmra.mxu1 %vm590_vm1, %v376_v40 }
  0x31   : > { %1355 = vmatpush3.bf16.msra.mxu0 %v1403_v43  ;;  %1387 = vmatpush3.bf16.msra.mxu1 %v1403_v43 }
  0xd3   : > { %v1290_v44 = vpop.f32.mrf.mxu0  ;;  %v1318_v45 = vpop.f32.mrf.mxu1 }
  0xd4   : > { %v711_v47 = vadd.f32 %v1318_v45, %v1290_v44 }
  0xd5   : > { %v511_v48 = vpop.f32.mrf.mxu0  ;;  %v705_v49 = vpop.f32.mrf.mxu1 }
  0xd6   : > { %v792_v50 = vadd.f32 %v1587_v46, %v711_v47  ;;  %v706_v51 = vadd.f32 %v705_v49, %v511_v48 }
  0xd7   : > { %v1293_v52 = vpop.f32.mrf.mxu0  ;;  %v1321_v53 = vpop.f32.mrf.mxu1 }
  0xd8   : > { %v791_v54 = vadd.f32 %v1587_v46, %v706_v51  ;;  %v721_v55 = vadd.f32 %v1321_v53, %v1293_v52  ;;  %v808_v58 = vmax.f32 %v792_v50, 0.0 }
  0xd9   : > { %v521_v56 = vpop.f32.mrf.mxu0  ;;  %v715_v57 = vpop.f32.mrf.mxu1 }
  0xda   : > { %v807_v59 = vmax.f32 %v791_v54, 0.0  ;;  %v794_v60 = vadd.f32 %v1587_v46, %v721_v55  ;;  %v716_v61 = vadd.f32 %v715_v57, %v521_v56 }
  0xdb   : > { %v1296_v62 = vpop.f32.mrf.mxu0  ;;  %v1324_v63 = vpop.f32.mrf.mxu1 }
  0xdc   : > { %v793_v0 = vadd.f32 %v1587_v46, %v716_v61  ;;  %v731_v1 = vadd.f32 %v1324_v63, %v1296_v62  ;;  %v823_v2 = vpack.c.bf16 %v808_v58, %v807_v59  ;;  %v810_v5 = vmax.f32 %v794_v60, 0.0 }
  0xdd   : > { %v531_v3 = vpop.f32.mrf.mxu0  ;;  %v725_v4 = vpop.f32.mrf.mxu1 }
  0xde   : > { %v809_v6 = vmax.f32 %v793_v0, 0.0  ;;  %v796_v7 = vadd.f32 %v1587_v46, %v731_v1  ;;  %v726_v8 = vadd.f32 %v725_v4, %v531_v3  ;;  %1356 = vmatprep.mubr.bf16.mxu0 %v823_v2 }
  0xdf   : > { %v1299_v9 = vpop.f32.mrf.mxu0  ;;  %v1327_v10 = vpop.f32.mrf.mxu1 }
  0xe0   : > { %v824_v11 = vpack.c.bf16 %v810_v5, %v809_v6  ;;  %v795_v12 = vadd.f32 %v1587_v46, %v726_v8  ;;  %v741_v13 = vadd.f32 %v1327_v10, %v1299_v9  ;;  %v812_v16 = vmax.f32 %v796_v7, 0.0  ;;  %v1608_v6 = vld [vmem:[%s1694_s6] ss:$0 sm:$0xff] }
  0xe1   : > { %v541_v14 = vpop.f32.mrf.mxu0  ;;  %v735_v15 = vpop.f32.mrf.mxu1  ;;  %v1614_v10 = vld [vmem:[%s1695_s7] ss:$0 sm:$0xff] }
  0xe2   : > { %v811_v17 = vmax.f32 %v795_v12, 0.0  ;;  %v798_v18 = vadd.f32 %v1587_v46, %v741_v13  ;;  %v736_v19 = vadd.f32 %v735_v15, %v541_v14  ;;  %1357 = vmatmul.mubr.bf16.vlgmr.msra.gmra.mxu0 %v824_v11 }
  0xe3   : > { %v1302_v20 = vpop.f32.mrf.mxu0  ;;  %v1330_v21 = vpop.f32.mrf.mxu1 }
  0xe4   : > { %v797_v22 = vadd.f32 %v1587_v46, %v736_v19  ;;  %v751_v23 = vadd.f32 %v1330_v21, %v1302_v20  ;;  %v825_v24 = vpack.c.bf16 %v812_v16, %v811_v17  ;;  %v814_v27 = vmax.f32 %v798_v18, 0.0 }
  0xe5   : > { %v551_v25 = vpop.f32.mrf.mxu0  ;;  %v745_v26 = vpop.f32.mrf.mxu1 }
  0xe6   : > { %v813_v28 = vmax.f32 %v797_v22, 0.0  ;;  %v800_v29 = vadd.f32 %v1587_v46, %v751_v23  ;;  %v746_v30 = vadd.f32 %v745_v26, %v551_v25  ;;  %1360 = vmatprep.mubr.bf16.mxu0 %v825_v24 }
  0xe7   : > { %v1305_v31 = vpop.f32.mrf.mxu0  ;;  %v1333_v32 = vpop.f32.mrf.mxu1 }
  0xe8   : > { %v799_v33 = vadd.f32 %v1587_v46, %v746_v30  ;;  %v761_v34 = vadd.f32 %v1333_v32, %v1305_v31  ;;  %v826_v35 = vpack.c.bf16 %v814_v27, %v813_v28  ;;  %v816_v38 = vmax.f32 %v800_v29, 0.0 }
  0xe9   : > { %v561_v36 = vpop.f32.mrf.mxu0  ;;  %v755_v37 = vpop.f32.mrf.mxu1 }
  0xea   : > { %v815_v39 = vmax.f32 %v799_v33, 0.0  ;;  %v802_v40 = vadd.f32 %v1587_v46, %v761_v34  ;;  %v756_v41 = vadd.f32 %v755_v37, %v561_v36  ;;  %1361 = vmatmul.mubr.bf16.gmra.mxu0 %v826_v35 }
  0xeb   : > { %v1308_v42 = vpop.f32.mrf.mxu0  ;;  %v1336_v43 = vpop.f32.mrf.mxu1 }
  0xec   : > { %v801_v44 = vadd.f32 %v1587_v46, %v756_v41  ;;  %v771_v45 = vadd.f32 %v1336_v43, %v1308_v42  ;;  %v827_v47 = vpack.c.bf16 %v816_v38, %v815_v39  ;;  %v818_v50 = vmax.f32 %v802_v40, 0.0 }
  0xed   : > { %v571_v48 = vpop.f32.mrf.mxu0  ;;  %v765_v49 = vpop.f32.mrf.mxu1 }
  0xee   : > { %v817_v51 = vmax.f32 %v801_v44, 0.0  ;;  %v804_v52 = vadd.f32 %v1587_v46, %v771_v45  ;;  %v766_v53 = vadd.f32 %v765_v49, %v571_v48  ;;  %1364 = vmatprep.mubr.bf16.mxu0 %v827_v47 }
  0xef   : > { %v1311_v54 = vpop.f32.mrf.mxu0  ;;  %v1339_v55 = vpop.f32.mrf.mxu1 }
  0xf0   : > { %v803_v56 = vadd.f32 %v1587_v46, %v766_v53  ;;  %v781_v57 = vadd.f32 %v1339_v55, %v1311_v54  ;;  %v828_v58 = vpack.c.bf16 %v818_v50, %v817_v51  ;;  %v820_v61 = vmax.f32 %v804_v52, 0.0 }
  0xf1   : > { %v581_v59 = vpop.f32.mrf.mxu0  ;;  %v775_v60 = vpop.f32.mrf.mxu1 }
  0xf2   : > { %v819_v62 = vmax.f32 %v803_v56, 0.0  ;;  %v806_v63 = vadd.f32 %v1587_v46, %v781_v57  ;;  %v776_v0 = vadd.f32 %v775_v60, %v581_v59  ;;  %1365 = vmatmul.mubr.bf16.gmra.mxu0 %v828_v58 }
  0xf4   : > { %v805_v1 = vadd.f32 %v1587_v46, %v776_v0  ;;  %v829_v2 = vpack.c.bf16 %v820_v61, %v819_v62  ;;  %v822_v3 = vmax.f32 %v806_v63, 0.0 }
  0xf6   : > { %v821_v4 = vmax.f32 %v805_v1, 0.0  ;;  %1368 = vmatprep.mubr.bf16.mxu1 %v829_v2 }
  0xf8   : > { %v830_v5 = vpack.c.bf16 %v822_v3, %v821_v4 }
  0xfa   : > { %1369 = vmatmul.mubr.bf16.vlgmr.msra.gmra.mxu1 %v830_v5 }
 0x1a2   : > { %v1358_v7 = vpop.f32.mrf.mxu0 }
 0x1a3   : > { %v945_v8 = vadd.f32 %v1358_v7, %v1608_v6 }
 0x1a4   : > { %v936_v9 = vpop.f32.mrf.mxu0 }
 0x1a5   : > { %v1001_v46 = vmax.f32 %v945_v8, 0.0  ;;  %v937_v11 = vadd.f32 %v1608_v6, %v936_v9  ;;  %v1232_v9 = vld [vmem:[#allocation2] ss:$0 sm:$0xff] }
 0x1a6   : > { %v1359_v12 = vpop.f32.mrf.mxu0 }
 0x1a7   : > { %v999_v13 = vmax.f32 %v937_v11, 0.0  ;;  %v948_v14 = vadd.f32 %v1359_v12, %v1608_v6  ;;  %v1024_v15 = vmul.f32 %v1614_v10, %v1001_v46 }
 0x1a8   : > { %v939_v16 = vpop.f32.mrf.mxu0 }
 0x1a9   : > { %v1002_v17 = vmax.f32 %v948_v14, 0.0  ;;  %v940_v18 = vadd.f32 %v1608_v6, %v939_v16  ;;  %1042 = vadd.xlane.f32.xlu1 %v1024_v15  ;;  %v1022_v19 = vmul.f32 %v1614_v10, %v999_v13 }
 0x1aa   : > { %v1362_v20 = vpop.f32.mrf.mxu0 }
 0x1ab   : > { %v1000_v21 = vmax.f32 %v940_v18, 0.0  ;;  %v961_v22 = vadd.f32 %v1362_v20, %v1608_v6  ;;  %1038 = vadd.xlane.f32.xlu0 %v1022_v19  ;;  %v1025_v23 = vmul.f32 %v1614_v10, %v1002_v17 }
 0x1ac   : > { %v952_v24 = vpop.f32.mrf.mxu0 }
 0x1ad   : > { %v1005_v25 = vmax.f32 %v961_v22, 0.0  ;;  %v953_v26 = vadd.f32 %v1608_v6, %v952_v24  ;;  %1044 = vadd.xlane.f32.xlu1 %v1025_v23  ;;  %v1023_v27 = vmul.f32 %v1614_v10, %v1000_v21 }
 0x1ae   : > { %v1363_v28 = vpop.f32.mrf.mxu0 }
 0x1af   : > { %v964_v29 = vadd.f32 %v1363_v28, %v1608_v6  ;;  %1040 = vadd.xlane.f32.xlu0 %v1023_v27  ;;  %v1003_v31 = vmax.f32 %v953_v26, 0.0  ;;  %v1028_v34 = vmul.f32 %v1614_v10, %v1005_v25 }
 0x1b0   : > { %v955_v30 = vpop.f32.mrf.mxu0 }
 0x1b1   : > { %v1006_v32 = vmax.f32 %v964_v29, 0.0  ;;  %v956_v33 = vadd.f32 %v1608_v6, %v955_v30  ;;  %v1026_v42 = vmul.f32 %v1614_v10, %v1003_v31 }
 0x1b2   : > { %v1366_v35 = vpop.f32.mrf.mxu0 }
 0x1b3   : > { %v1004_v36 = vmax.f32 %v956_v33, 0.0  ;;  %v977_v37 = vadd.f32 %v1366_v35, %v1608_v6  ;;  %1050 = vadd.xlane.f32.xlu0 %v1028_v34  ;;  %v1029_v38 = vmul.f32 %v1614_v10, %v1006_v32 }
 0x1b4   : > { %v968_v39 = vpop.f32.mrf.mxu0 }
 0x1b5   : > { %v1009_v40 = vmax.f32 %v977_v37, 0.0  ;;  %v969_v41 = vadd.f32 %v1608_v6, %v968_v39  ;;  %1052 = vadd.xlane.f32.xlu1 %v1029_v38  ;;  %v1027_v45 = vmul.f32 %v1614_v10, %v1004_v36 }
 0x1b6   : > { %v1367_v43 = vpop.f32.mrf.mxu0 }
 0x1b7   : > { %v980_v44 = vadd.f32 %v1367_v43, %v1608_v6  ;;  %1046 = vadd.xlane.f32.xlu0 %v1026_v42  ;;  %v1007_v48 = vmax.f32 %v969_v41, 0.0  ;;  %v1032_v51 = vmul.f32 %v1614_v10, %v1009_v40 }
 0x1b8   : > { %v971_v47 = vpop.f32.mrf.mxu0 }
 0x1b9   : > { %v1010_v49 = vmax.f32 %v980_v44, 0.0  ;;  %v972_v50 = vadd.f32 %v1608_v6, %v971_v47  ;;  %1048 = vadd.xlane.f32.xlu1 %v1027_v45  ;;  %v1030_v58 = vmul.f32 %v1614_v10, %v1007_v48 }
 0x1ba   : > { %v1370_v52 = vpop.f32.mrf.mxu1 }
 0x1bb   : > { %v1008_v53 = vmax.f32 %v972_v50, 0.0  ;;  %1058 = vadd.xlane.f32.xlu0 %v1032_v51  ;;  %v1033_v54 = vmul.f32 %v1614_v10, %v1010_v49  ;;  %v993_v56 = vadd.f32 %v1370_v52, %v1608_v6 }
 0x1bc   : > { %v984_v55 = vpop.f32.mrf.mxu1 }
 0x1bd   : > { %v985_v57 = vadd.f32 %v1608_v6, %v984_v55  ;;  %1060 = vadd.xlane.f32.xlu1 %v1033_v54  ;;  %v1031_v61 = vmul.f32 %v1614_v10, %v1008_v53  ;;  %v1013_v63 = vmax.f32 %v993_v56, 0.0 }
 0x1be   : > { %v1371_v59 = vpop.f32.mrf.mxu1 }
 0x1bf   : > { %v1011_v60 = vmax.f32 %v985_v57, 0.0  ;;  %1054 = vadd.xlane.f32.xlu0 %v1030_v58  ;;  %v996_v0 = vadd.f32 %v1371_v59, %v1608_v6  ;;  %v1036_v7 = vmul.f32 %v1614_v10, %v1013_v63 }
 0x1c0   : > { %v987_v62 = vpop.f32.mrf.mxu1 }
 0x1c1   : > { %v988_v1 = vadd.f32 %v1608_v6, %v987_v62  ;;  %1056 = vadd.xlane.f32.xlu1 %v1031_v61  ;;  %v1034_v2 = vmul.f32 %v1614_v10, %v1011_v60  ;;  %v1014_v4 = vmax.f32 %v996_v0, 0.0 }
 0x1c3   : > { %v1012_v3 = vmax.f32 %v988_v1, 0.0  ;;  %1062 = vadd.xlane.f32.xlu0 %v1034_v2  ;;  %v1037_v8 = vmul.f32 %v1614_v10, %v1014_v4 }
 0x1c5   : > { %v1035_v5 = vmul.f32 %v1614_v10, %v1012_v3 }
 0x1c7   : > { %1064 = vadd.xlane.f32.xlu1 %v1035_v5  ;;  %1066 = vadd.xlane.f32.xlu0 %v1036_v7 }
 0x1cb   : > { %1068 = vadd.xlane.f32.xlu1 %v1037_v8 }
 0x232   : > { %v1043_v6 = vpop.xlane.xlu1 %1042 }
 0x233   : > { %v1079_v46 = vadd.f32 %v1232_v9, %v1043_v6 }
 0x234   : > { %v1039_v11 = vpop.xlane.xlu0 %1038 }
 0x235   : > { %1096 = vst.msk [vmem:[%s1651_s30 + $0x10] sm:$0xff] %vm1093_vm2, %v1079_v46  ;;  %v1077_v10 = vadd.f32 %v1232_v9, %v1039_v11 }
 0x236   : > { %v1045_v12 = vpop.xlane.xlu1 %1044 }
 0x237   : > { %1094 = vst.msk [vmem:[%s1651_s30] sm:$0xff] %vm1093_vm2, %v1077_v10  ;;  %v1080_v13 = vadd.f32 %v1232_v9, %v1045_v12 }
 0x238   : > { %v1041_v14 = vpop.xlane.xlu0 %1040 }
 0x239   : > { %1097 = vst.msk [vmem:[%s1651_s30 + $0x18] sm:$0xff] %vm1093_vm2, %v1080_v13  ;;  %v1078_v15 = vadd.f32 %v1232_v9, %v1041_v14 }
 0x23b   : > { %1095 = vst.msk [vmem:[%s1651_s30 + $0x8] sm:$0xff] %vm1093_vm2, %v1078_v15 }
 0x23c   : > { %v1051_v16 = vpop.xlane.xlu0 %1050 }
 0x23d   : > { %v1083_v17 = vadd.f32 %v1232_v9, %v1051_v16 }
 0x23e   : > { %v1053_v18 = vpop.xlane.xlu1 %1052 }
 0x23f   : > { %1100 = vst.msk [vmem:[%s1651_s30 + $0x30] sm:$0xff] %vm1093_vm2, %v1083_v17  ;;  %v1084_v19 = vadd.f32 %v1232_v9, %v1053_v18 }
 0x240   : > { %v1047_v20 = vpop.xlane.xlu0 %1046 }
 0x241   : > { %1101 = vst.msk [vmem:[%s1651_s30 + $0x38] sm:$0xff] %vm1093_vm2, %v1084_v19  ;;  %v1081_v21 = vadd.f32 %v1232_v9, %v1047_v20 }
 0x242   : > { %v1049_v22 = vpop.xlane.xlu1 %1048 }
 0x243   : > { %1098 = vst.msk [vmem:[%s1651_s30 + $0x20] sm:$0xff] %vm1093_vm2, %v1081_v21  ;;  %v1082_v23 = vadd.f32 %v1232_v9, %v1049_v22 }
 0x244   : > { %v1059_v24 = vpop.xlane.xlu0 %1058 }
 0x245   : > { %1099 = vst.msk [vmem:[%s1651_s30 + $0x28] sm:$0xff] %vm1093_vm2, %v1082_v23  ;;  %v1087_v25 = vadd.f32 %v1232_v9, %v1059_v24 }
 0x246   : > { %v1061_v26 = vpop.xlane.xlu1 %1060 }
 0x247   : > { %1104 = vst.msk [vmem:[%s1651_s30 + $0x50] sm:$0xff] %vm1093_vm2, %v1087_v25  ;;  %v1088_v27 = vadd.f32 %v1232_v9, %v1061_v26 }
 0x248   : > { %v1055_v28 = vpop.xlane.xlu0 %1054 }
 0x249   : > { %1105 = vst.msk [vmem:[%s1651_s30 + $0x58] sm:$0xff] %vm1093_vm2, %v1088_v27  ;;  %v1085_v29 = vadd.f32 %v1232_v9, %v1055_v28 }
 0x24a   : > { %v1057_v30 = vpop.xlane.xlu1 %1056 }
 0x24b   : > { %1102 = vst.msk [vmem:[%s1651_s30 + $0x40] sm:$0xff] %vm1093_vm2, %v1085_v29  ;;  %v1086_v31 = vadd.f32 %v1232_v9, %v1057_v30 }
 0x24c   : > { %v1063_v32 = vpop.xlane.xlu0 %1062 }
 0x24d   : > { %1103 = vst.msk [vmem:[%s1651_s30 + $0x48] sm:$0xff] %vm1093_vm2, %v1086_v31  ;;  %v1089_v33 = vadd.f32 %v1232_v9, %v1063_v32 }
 0x24f   : > { %1106 = vst.msk [vmem:[%s1651_s30 + $0x60] sm:$0xff] %vm1093_vm2, %v1089_v33 }
 0x250   : > { %v1065_v34 = vpop.xlane.xlu1 %1064  ;;  %v1067_v35 = vpop.xlane.xlu0 %1066 }
 0x251   : > { %v1090_v36 = vadd.f32 %v1232_v9, %v1065_v34  ;;  %v1091_v37 = vadd.f32 %v1232_v9, %v1067_v35 }
 0x253   : > { %1107 = vst.msk [vmem:[%s1651_s30 + $0x68] sm:$0xff] %vm1093_vm2, %v1090_v36  ;;  %1108 = vst.msk [vmem:[%s1651_s30 + $0x70] sm:$0xff] %vm1093_vm2, %v1091_v37 }
 0x254   : > { %v1069_v38 = vpop.xlane.xlu1 %1068 }
 0x255   : > { %v1092_v39 = vadd.f32 %v1232_v9, %v1069_v38 }
 0x257   : > { %1109 = vst.msk [vmem:[%s1651_s30 + $0x78] sm:$0xff] %vm1093_vm2, %v1092_v39 }
 0x258 PF: > { %s21_s11 = sadd.s32 1, %s1410_s11  }
 0x259   : > { %p18_p4 = scmp.ge.s32.totalorder %s21_s11, 4  }
 0x25b   :  { %20 = sbr.rel (!%p18_p4) target bundleno = 3 (0x3), region = 89 }

</bundles_post_ra>
